<compile_context>
chip_gen: v5e
topology: v5e:2x2
jax: 0.10.0
libtpu: 0.0.40
codegen_flags: <defaults>
</compile_context>

<pallas_src>
import jax
import jax.numpy as jnp
import numpy as np
from jax.experimental import pallas as pl
from jax.experimental.pallas import tpu as pltpu


def _gather_copy_kernel(sel_ref, x_ref, o_ref):
    # All addressing is done by the BlockSpec index_maps using the
    # scalar-prefetched channel ids; the body is a straight tile copy.
    del sel_ref
    o_ref[...] = x_ref[...]


def channel_select_nchw(x_nchw, sel_idx):
    """y[n, k, h, w] = x[n, sel_idx[k], h, w] via a Pallas channel gather."""
    N, C, H, W = x_nchw.shape
    K = sel_idx.shape[0]
    HW = H * W

    # Lane-dense view of each channel slab: fold H*W into (HW/128, 128) when
    # possible (contiguous reshape => free).  Fallback keeps the full (H, W)
    # tile, which still satisfies the "last two dims equal full dims" rule.
    if HW % 128 == 0:
        Hf, Wf = HW // 128, 128
    else:
        Hf, Wf = H, W
    xv = x_nchw.reshape(N, C, Hf, Wf)

    # Batch tile: largest divisor of N that (a) leaves >=2 batch tiles when
    # N >= 2 (so the parallel axis can shard across v7x's 2 TCs) and
    # (b) keeps the double-buffered block well inside VMEM.
    itemsize = np.dtype(x_nchw.dtype).itemsize
    budget = 4 * 1024 * 1024  # bytes per input block
    bn_cap = max(1, N // 2) if N >= 2 else 1
    bn = 1
    for d in range(1, N + 1):
        if N % d == 0 and d <= bn_cap and d * HW * itemsize <= budget:
            bn = d
    nb = N // bn

    grid_spec = pltpu.PrefetchScalarGridSpec(
        num_scalar_prefetch=1,  # sel_idx -> SMEM, visible to every index_map
        grid=(nb, K),
        in_specs=[
            pl.BlockSpec((bn, 1, Hf, Wf),
                         lambda n, k, sel: (n, sel[k], 0, 0)),
        ],
        out_specs=pl.BlockSpec((bn, 1, Hf, Wf),
                               lambda n, k, sel: (n, k, 0, 0)),
    )

    out = pl.pallas_call(
        _gather_copy_kernel,
        out_shape=jax.ShapeDtypeStruct((N, K, Hf, Wf), x_nchw.dtype),
        grid_spec=grid_spec,
        compiler_params=pltpu.CompilerParams(
            dimension_semantics=("parallel", "arbitrary")),
    )(sel_idx, xv)

    return out.reshape(N, K, H, W)


class ChannelSelection:
    """JAX/Pallas port of the PyTorch `channel_selection` module."""

    def __init__(self, num_channels, mask):
        mask = np.asarray(mask)
        assert len(mask) == num_channels
        # __init__: indexes = ones(num_channels) * mask
        self.indexes = np.ones(num_channels, dtype=np.float32) * mask.astype(np.float32)
        # forward(): selected_index = np.squeeze(np.argwhere(indexes)) with the
        # size==1 resize special case — equivalent to flatnonzero for a 1-D
        # vector.  Output channel count is data-dependent in PyTorch; the mask
        # is static, so the indices are resolved here (host side).
        sel = np.flatnonzero(self.indexes).astype(np.int32)
        if sel.size == 0:
            # TODO(synk): an all-zero mask yields a zero-channel output in
            # PyTorch; zero-sized Pallas outputs are not supported.
            raise ValueError("channel_selection: mask selects zero channels")
        self.sel = jnp.asarray(sel)

    def __call__(self, x_nchw):
        return channel_select_nchw(x_nchw, self.sel)


if __name__ == "__main__":
    N, C, H, W = 2, 4, 16, 16
    mask = np.array([1.0, 0.0, 1.0, 1.0], dtype=np.float32)  # prune channel 1

    key = jax.random.PRNGKey(0)
    x = jax.random.normal(key, (N, C, H, W), jnp.float32)

    layer = ChannelSelection(C, mask)
    fwd = jax.jit(channel_select_nchw)
    y = fwd(x, layer.sel)
    jax.block_until_ready(y)

    ref = x[:, np.flatnonzero(mask), :, :]
    assert y.shape == (N, int(mask.sum()), H, W)
    assert bool(jnp.array_equal(y, ref))
    print("KERNEL_OK")
</pallas_src>

<mosaic_0001>
module attributes {stable_mosaic.version = 11 : i64} {
  func.func @_gather_copy_kernel(%arg0: i32, %arg1: i32, %arg2: memref<3xi32, #tpu.memory_space<smem>>, %arg3: memref<1x1x2x128xf32, #tpu.memory_space<vmem>>, %arg4: memref<1x1x2x128xf32, #tpu.memory_space<vmem>>) attributes {dimension_semantics = [#tpu.dimension_semantics<parallel>, #tpu.dimension_semantics<arbitrary>], iteration_bounds = array<i64: 2, 3>, scalar_prefetch = 1 : i64, scratch_operands = 0 : i64, tpu.core_type = #tpu.core_type<tc>, window_params = [{transform_indices = @transform_0, window_bounds = array<i64: 1, 1, 2, 128>}, {transform_indices = @transform_1, window_bounds = array<i64: 1, 1, 2, 128>}]} {
    %c0 = arith.constant 0 : index
    %c0_0 = arith.constant 0 : index
    %c0_1 = arith.constant 0 : index
    %c0_2 = arith.constant 0 : index
    %0 = vector.load %arg3[%c0, %c0_0, %c0_1, %c0_2] : memref<1x1x2x128xf32, #tpu.memory_space<vmem>>, vector<1x1x2x128xf32>
    %c0_3 = arith.constant 0 : index
    %c0_4 = arith.constant 0 : index
    %c0_5 = arith.constant 0 : index
    %c0_6 = arith.constant 0 : index
    %1 = vector.load %arg4[%c0_3, %c0_4, %c0_5, %c0_6] : memref<1x1x2x128xf32, #tpu.memory_space<vmem>>, vector<1x1x2x128xf32>
    tpu.vector_store %arg4[%c0_3, %c0_4, %c0_5, %c0_6], %0 {strides = array<i32>} : memref<1x1x2x128xf32, #tpu.memory_space<vmem>>, vector<1x1x2x128xf32>,
    return
  }
  func.func @transform_0(%arg0: i32, %arg1: i32, %arg2: memref<3xi32, #tpu.memory_space<smem>>) -> (i32, i32, i32, i32) {
    %0 = arith.index_cast %arg1 : i32 to index
    %1 = memref.load %arg2[%0] : memref<3xi32, #tpu.memory_space<smem>>
    %c0_i32 = arith.constant 0 : i32
    %c0_i32_0 = arith.constant 0 : i32
    %c0_i32_1 = arith.constant 0 : i32
    return %arg0, %1, %c0_i32, %c0_i32_0 : i32, i32, i32, i32
  }
  func.func @transform_1(%arg0: i32, %arg1: i32, %arg2: memref<3xi32, #tpu.memory_space<smem>>) -> (i32, i32, i32, i32) {
    %c0_i32 = arith.constant 0 : i32
    %c0_i32_0 = arith.constant 0 : i32
    %c0_i32_1 = arith.constant 0 : i32
    return %arg0, %arg1, %c0_i32, %c0_i32_0 : i32, i32, i32, i32
  }
}

</mosaic_0001>

<bundles_post_ra>
// kernel: channel_select_nchw.1
= control target key start
LH: loop header
LB: loop body
LE: loop exit
PB: predicated region body
PF: predicated region fallthrough
CT: control target
= control target key end

     0   :  { %s358_s12 = smov [#allocation3]   ;;  %s422_s0 = inlined_call_operand.vmem [shape: s32[3], index: 0, kind: input, shape index: {}]   ;;  %s423_s1 = inlined_call_operand.vmem [shape: f32[2,4,2,128], index: 1, kind: input, shape index: {}]   ;;  %s424_s2 = inlined_call_operand.vmem [shape: f32[2,3,2,128], index: 2, kind: output, shape index: {}]  }
   0x1   :  { %s8_s11 = sshll.u32 %s422_s0, 4  ;;  %s9_s11 = int_to_ptr.vmem [resolvable:$true] %s8_s11 }
   0x2   :  { %11 = dma.vmem_to_smem %s9_s11, 16, %s358_s12, [#allocation2] }
   0x3   :  { %336 = dma.done.wait [#allocation2], 16 }
   0x4   :  { %337 = vsyncadd [#allocation2], 4294967280 }
   0x5   :  { %14 = sfence }
   0x6   :  { %s377_s13 = smov 0   ;;  %s379_s14 = smov 0  }
   0x7   :  { %s381_s15 = smov 0   ;;  %s383_s16 = smov 0  }
   0x8   :  { %s385_s17 = smov 0  }
   0x9 LB: > { %s29_s0 = sadd.s32 1, %s348_s15  ;;  %s32_s18 = sadd.s32 1, %s352_s16  ;;  %s356_s17 = sphi %s385_s17, %s20_s17   ;;  %s352_s16 = sphi %s383_s16, %s428_s16   ;;  %s348_s15 = sphi %s381_s15, %s427_s15   ;;  %s344_s14 = sphi %s379_s14, %s426_s14   ;;  %s340_s13 = sphi %s377_s13, %s425_s13  }
   0xa   : > { %p30_p0 = scmp.ge.s32.totalorder %s29_s0, 3  ;;  %p256_p1 = scmp.ge.s32.totalorder %s356_s17, 1 }
   0xb   : > { %p119_p2 = scmp.lt.s32.totalorder %s356_s17, 7 }
   0xc   : > { %s430_s0 = smov (%p30_p0, %s29_s0), 0  ;;  %s432_s18 = smov (!%p30_p0, %s32_s18), %s352_s16 }
   0xd   : > { %p120_p3 = pnand %p256_p1, %p119_p2  ;;  %p34_p4 = scmp.ge.s32.totalorder %s432_s18, 2 }
   0xe   : > { %s146_s19 = sld [smem:[#allocation3 + %s340_s13]] (!%p120_p3)  ;;  %p147_p5 = scmp.lt.s32.totalorder (!%p120_p3), %s344_s14, 1 }
   0xf   : > { %s434_s18 = smov (%p34_p4, %s432_s18), 0  ;;  %123 = sbr.rel (%p120_p3) target bundleno = 29 (0x1d), region = 24 }
  0x10   : > { %p158_p6 = scmp.lt.s32.totalorder (!%p120_p3), %s340_s13, 2 }
  0x14   : > { %s436_s14 = smov (!%p147_p5, %s344_s14), 1  ;;  %s438_s13 = smov (!%p158_p6, %s340_s13), 2 }
  0x15   : > { %s262_s20 = smul.u32 3, %s436_s14  ;;  %p149_p7 = scmp.lt.s32.totalorder %s146_s19, 3 }
  0x16   : > { %s257_s22 = sshll.u32 %s436_s14, 2 }
  0x17   : > { %s161_s21 = sadd.s32 %s262_s20, %s438_s13  ;;  %s440_s19 = smov (!%p149_p7, %s146_s19), 3 }
  0x18   : > { %s259_s23 = sshll.u32 %s161_s21, 1  ;;  %s152_s24 = sadd.s32 %s257_s22, %s440_s19 }
  0x19   : > { %s258_s25 = sshll.u32 %s152_s24, 1  ;;  %s163_s28 = scalar_lea.vmem %s424_s2, %s259_s23 }
  0x1a   : > { %s154_s3 = scalar_lea.vmem %s423_s1, %s258_s25 }
  0x1b   : > { %v164_v0 = vld [vmem:[%s154_s3] sm:$0x3] }
  0x1c   : > { %165 = vst [vmem:[%s163_s28] sm:$0x3] %v164_v0 }
  0x1d PF: > { %s20_s17 = sadd.s32 1, %s356_s17   ;;  %s425_s13 = smov %s348_s15 }
  0x1e   : > { %p17_p8 = scmp.ge.s32.totalorder %s20_s17, 8   ;;  %s426_s14 = smov %s352_s16 }
  0x1f   : > { %s427_s15 = smov %s430_s0  ;;  %s428_s16 = smov %s434_s18 }
  0x20   :  { %19 = sbr.rel (!%p17_p8) target bundleno = 9 (0x9), region = 54 }

</bundles_post_ra>
